<compile_context>
chip_gen: v5e
topology: v5e:2x2
jax: 0.10.0
libtpu: 0.0.40
codegen_flags: <defaults>
</compile_context>

<pallas_src>
import math
import functools

import jax
import jax.numpy as jnp
from jax.experimental import pallas as pl
from jax.experimental.pallas import tpu as pltpu


OUT_LANES = 128  # lane-dense width for the fc_top1 head output


# ----------------------------------------------------------------------------
# In-kernel helpers
# ----------------------------------------------------------------------------
def _layer_norm(x, gamma, beta, eps=1e-5):
    mu = jnp.mean(x, axis=-1, keepdims=True)
    xc = x - mu
    var = jnp.mean(xc * xc, axis=-1, keepdims=True)
    return xc * jax.lax.rsqrt(var + eps) * gamma + beta


def _gelu_exact(x):
    # F.gelu default = exact (erf-based) GELU
    return 0.5 * x * (1.0 + jax.lax.erf(x * (1.0 / math.sqrt(2.0))))


# ----------------------------------------------------------------------------
# Fused kernel: grid = (batch, layer); activation carried in VMEM scratch
# ----------------------------------------------------------------------------
def _fused_model_kernel(x_ref, wqkv_ref, bqkv_ref, wo_ref, vec_d_ref,
                        w1_ref, w2_ref, w3_ref, vec_f_ref,
                        wfc_ref, bfc_ref,
                        o_ref, act_ref, *, d_model, nhead, seq_len):
    D, H, T = d_model, nhead, seq_len
    Dh = D // H
    scale = 1.0 / math.sqrt(Dh)

    layer = pl.program_id(1)
    n_layers = pl.num_programs(1)

    # first layer of this sequence: load embedded input into the resident buffer
    @pl.when(layer == 0)
    def _():
        act_ref[...] = x_ref[0]

    x = act_ref[...]                                # (T, D) f32
    x_b = x.astype(jnp.bfloat16)

    wqkv = wqkv_ref[0]                              # (3H, D, Dh) bf16, head-major
    bqkv = bqkv_ref[0]                              # (3H, 1, Dh) f32
    wo = wo_ref[0]                                  # (H, Dh, D) bf16
    vec_d = vec_d_ref[0]                            # (6, D) f32 packed vectors
    vec_f = vec_f_ref[0]                            # (2, F) f32 packed vectors
    bo, g1, be1 = vec_d[0:1], vec_d[1:2], vec_d[2:3]
    b3, g2, be2 = vec_d[3:4], vec_d[4:5], vec_d[5:6]
    b1, b2 = vec_f[0:1], vec_f[1:2]

    # ---- self attention (per-sequence, head-batched; dropout_attn = identity) ----
    # batched contraction pattern: contract lhs last dim with rhs dim 1, batch dim 0
    dn_bmm = (((2,), (1,)), ((0,), (0,)))
    dn_qkT = (((2,), (2,)), ((0,), (0,)))

    xh = jnp.broadcast_to(x_b[None, :, :], (3 * H, T, D))
    qkv = jax.lax.dot_general(xh, wqkv, dn_bmm,
                              preferred_element_type=jnp.float32) + bqkv   # (3H, T, Dh)
    qkv_b = qkv.astype(jnp.bfloat16)
    q, k, v = qkv_b[:H], qkv_b[H:2 * H], qkv_b[2 * H:]

    s = jax.lax.dot_general(q, k, dn_qkT,
                            preferred_element_type=jnp.float32) * scale    # (H, T, T)
    s = s - jnp.max(s, axis=-1, keepdims=True)
    p = jnp.exp(s)
    p = p * pl.reciprocal(jnp.sum(p, axis=-1, keepdims=True), approx=True)

    ctx = jax.lax.dot_general(p.astype(jnp.bfloat16), v, dn_bmm,
                              preferred_element_type=jnp.float32)          # (H, T, Dh)
    attn_h = jax.lax.dot_general(ctx.astype(jnp.bfloat16), wo, dn_bmm,
                                 preferred_element_type=jnp.float32)       # (H, T, D)
    attn = jnp.sum(attn_h, axis=0) + bo                                    # (T, D)

    # residual + norm1
    src = _layer_norm(x + attn, g1, be1)

    # ---- feed forward: linear1 -> gelu -> linear2 -> gelu -> linear3 ----
    src_b = src.astype(jnp.bfloat16)
    h1 = _gelu_exact(jnp.dot(src_b, w1_ref[0],
                             preferred_element_type=jnp.float32) + b1)
    h2 = _gelu_exact(jnp.dot(h1.astype(jnp.bfloat16), w2_ref[0],
                             preferred_element_type=jnp.float32) + b2)
    h3 = jnp.dot(h2.astype(jnp.bfloat16), w3_ref[0],
                 preferred_element_type=jnp.float32) + b3

    # residual + norm2 (dropout_ffn = identity in eval)
    out = _layer_norm(src + h3, g2, be2)
    act_ref[...] = out

    # fc_top1 head (lane-dense padded to OUT_LANES), written only on last layer
    @pl.when(layer == n_layers - 1)
    def _():
        head = jnp.dot(out.astype(jnp.bfloat16), wfc_ref[...],
                       preferred_element_type=jnp.float32) + bfc_ref[...]
        o_ref[0] = head.astype(o_ref.dtype)


def fused_transformer_pallas(x, kp, *, d_model, nhead, num_layers):
    """x: (B, T, D) f32 embedded + pos-encoded input; kp: kernel-ready params."""
    B, T, D = x.shape

    def const_spec(a):
        nd = a.ndim
        return pl.BlockSpec(tuple(a.shape), lambda b, l, _n=nd: (0,) * _n)

    def layer_spec(a):
        nd = a.ndim
        return pl.BlockSpec((1,) + tuple(a.shape[1:]),
                            lambda b, l, _n=nd: (l,) + (0,) * (_n - 1))

    def batch_spec(a):
        nd = a.ndim
        return pl.BlockSpec((1,) + tuple(a.shape[1:]),
                            lambda b, l, _n=nd: (b,) + (0,) * (_n - 1))

    layer_args = [kp["wqkv"], kp["bqkv"], kp["wo"], kp["vec_d"],
                  kp["w1"], kp["w2"], kp["w3"], kp["vec_f"]]
    args = [x] + layer_args + [kp["wfc"], kp["bfc"]]
    in_specs = ([batch_spec(x)]
                + [layer_spec(a) for a in layer_args]
                + [const_spec(kp["wfc"]), const_spec(kp["bfc"])])

    # Explicit scoped-VMEM budget (double-buffered blocks + residents + scratch),
    # floored at 32 MiB and capped at v7x's 64 MiB.
    def blk_bytes(a, leading_indexed):
        n = a.size // a.shape[0] if leading_indexed else a.size
        return int(n) * a.dtype.itemsize

    est = (2 * blk_bytes(x, True)
           + 2 * sum(blk_bytes(a, True) for a in layer_args)
           + blk_bytes(kp["wfc"], False) + blk_bytes(kp["bfc"], False)
           + 2 * T * OUT_LANES * 4
           + T * D * 4)
    vmem_limit = int(min(max(2 * est + (1 << 20), 32 * 1024 * 1024),
                         64 * 1024 * 1024))

    kernel = functools.partial(_fused_model_kernel,
                               d_model=d_model, nhead=nhead, seq_len=T)
    return pl.pallas_call(
        kernel,
        out_shape=jax.ShapeDtypeStruct((B, T, OUT_LANES), jnp.float32),
        grid=(B, num_layers),
        in_specs=in_specs,
        out_specs=pl.BlockSpec((1, T, OUT_LANES), lambda b, l: (b, 0, 0)),
        scratch_shapes=[pltpu.VMEM((T, D), jnp.float32)],
        compiler_params=pltpu.CompilerParams(
            dimension_semantics=("parallel", "arbitrary"),
            vmem_limit_bytes=vmem_limit),
    )(*args)


# ----------------------------------------------------------------------------
# Plain-JAX glue: FeatureEmbedder + PositionalEncoding
# ----------------------------------------------------------------------------
def feature_embedder(x, params, cat_cols):
    # x: (B, T, cat_len + num_dim); first cat_len columns are categorical ids as floats
    cat_len = len(cat_cols)
    cat_x = x[..., :cat_len].astype(jnp.int32)
    num_x = x[..., cat_len:]
    embs = []
    for i, c in enumerate(cat_cols):
        table = params["emb"][c]                 # (unique, emb_dim)
        embs.append(jnp.take(table, cat_x[..., i], axis=0))
    cat_emb = jnp.concatenate(embs, axis=-1)
    num_emb = num_x @ params["num_w"].T + params["num_b"]
    out = jnp.concatenate([cat_emb, num_emb], axis=-1)
    out = out @ params["out_w"].T + params["out_b"]
    return out


def positional_encoding_table(d_model, max_len):
    position = jnp.arange(max_len, dtype=jnp.float32)[:, None]
    div_term = jnp.exp(jnp.arange(0, d_model, 2, dtype=jnp.float32)
                       * (-math.log(10000.0) / d_model))
    pe = jnp.zeros((max_len, d_model), dtype=jnp.float32)
    pe = pe.at[:, 0::2].set(jnp.sin(position * div_term))
    if d_model % 2 == 1:
        pe = pe.at[:, 1::2].set(jnp.cos(position * div_term[:-1]))
    else:
        pe = pe.at[:, 1::2].set(jnp.cos(position * div_term))
    return pe


# ----------------------------------------------------------------------------
# Full model forward
# ----------------------------------------------------------------------------
def horse_transformer_forward(src, prep, *, cat_cols, d_model, nhead, num_layers):
    emb = feature_embedder(src, prep["fe"], cat_cols)              # (B, T, D)
    B, T, D = emb.shape
    emb = emb + prep["pe"][:T, :][None, :, :]                      # pos encoding
    out = fused_transformer_pallas(emb, prep["kp"],
                                   d_model=d_model, nhead=nhead,
                                   num_layers=num_layers)          # (B, T, 128)
    return out[..., :1]                                            # (B, T, 1)


# ----------------------------------------------------------------------------
# Deterministic parameter init (PyTorch layout) + one-time kernel-ready prep
# ----------------------------------------------------------------------------
def init_params(key, *, cat_unique, cat_cols, num_dim, d_model, nhead,
                num_layers, dim_feedforward, max_seq_len):
    def nrm(k, shape, scale=0.05):
        return scale * jax.random.normal(k, shape, dtype=jnp.float32)

    keys = iter(jax.random.split(key, 256))

    # FeatureEmbedder
    emb_tables = {}
    cat_out_dim = 0
    for c in cat_cols:
        u = cat_unique[c]
        emb_dim = max(min(16, u // 2 + 1), 4)
        emb_tables[c] = nrm(next(keys), (u, emb_dim))
        cat_out_dim += emb_dim
    fe = dict(
        emb=emb_tables,
        num_w=nrm(next(keys), (num_dim, num_dim)),
        num_b=nrm(next(keys), (num_dim,)),
        out_w=nrm(next(keys), (d_model, cat_out_dim + num_dim)),
        out_b=nrm(next(keys), (d_model,)),
    )

    layers = []
    for _ in range(num_layers):
        layers.append(dict(
            in_proj_w=nrm(next(keys), (3 * d_model, d_model)),
            in_proj_b=nrm(next(keys), (3 * d_model,)),
            out_proj_w=nrm(next(keys), (d_model, d_model)),
            out_proj_b=nrm(next(keys), (d_model,)),
            ln1_g=jnp.ones((d_model,), jnp.float32),
            ln1_b=jnp.zeros((d_model,), jnp.float32),
            w1=nrm(next(keys), (dim_feedforward, d_model)),
            b1=nrm(next(keys), (dim_feedforward,)),
            w2=nrm(next(keys), (dim_feedforward, dim_feedforward)),
            b2=nrm(next(keys), (dim_feedforward,)),
            w3=nrm(next(keys), (d_model, dim_feedforward)),
            b3=nrm(next(keys), (d_model,)),
            ln2_g=jnp.ones((d_model,), jnp.float32),
            ln2_b=jnp.zeros((d_model,), jnp.float32),
        ))

    return dict(
        fe=fe,
        pe=positional_encoding_table(d_model, max_seq_len),
        layers=layers,
        fc_w=nrm(next(keys), (1, d_model)),
        fc_b=nrm(next(keys), (1,)),
    )


def prepare_params(params, *, d_model, nhead, dim_feedforward):
    """One-time transpose / reshape / stacking of weights into kernel layout."""
    D, H = d_model, nhead
    Dh = D // H
    wdt = jnp.bfloat16
    layers = params["layers"]

    def per_layer_wqkv(lp):
        w = lp["in_proj_w"]                        # (3D, D), rows = [Q | K | V]
        blocks = []
        for s in range(3):
            for h in range(H):
                blocks.append(w[s * D + h * Dh: s * D + (h + 1) * Dh, :].T)  # (D, Dh)
        return jnp.stack(blocks)                   # (3H, D, Dh)

    def per_layer_bqkv(lp):
        b = lp["in_proj_b"]
        blocks = []
        for s in range(3):
            for h in range(H):
                blocks.append(b[s * D + h * Dh: s * D + (h + 1) * Dh].reshape(1, Dh))
        return jnp.stack(blocks)                   # (3H, 1, Dh)

    def per_layer_wo(lp):
        w = lp["out_proj_w"]                       # (D, D)
        return jnp.stack([w[:, h * Dh:(h + 1) * Dh].T for h in range(H)])  # (H, Dh, D)

    def per_layer_vec_d(lp):
        return jnp.stack([lp["out_proj_b"], lp["ln1_g"], lp["ln1_b"],
                          lp["b3"], lp["ln2_g"], lp["ln2_b"]])              # (6, D)

    def per_layer_vec_f(lp):
        return jnp.stack([lp["b1"], lp["b2"]])                              # (2, F)

    def stack(fn):
        return jnp.stack([fn(lp) for lp in layers])

    wfc = jnp.zeros((D, OUT_LANES), jnp.float32).at[:, 0].set(params["fc_w"][0])
    bfc = jnp.zeros((1, OUT_LANES), jnp.float32).at[0, 0].set(params["fc_b"][0])

    kp = dict(
        wqkv=stack(per_layer_wqkv).astype(wdt),     # (L, 3H, D, Dh) bf16
        bqkv=stack(per_layer_bqkv),                 # (L, 3H, 1, Dh) f32
        wo=stack(per_layer_wo).astype(wdt),         # (L, H, Dh, D)  bf16
        vec_d=stack(per_layer_vec_d),               # (L, 6, D)      f32
        w1=stack(lambda lp: lp["w1"].T).astype(wdt),    # (L, D, F) bf16
        w2=stack(lambda lp: lp["w2"].T).astype(wdt),    # (L, F, F) bf16
        w3=stack(lambda lp: lp["w3"].T).astype(wdt),    # (L, F, D) bf16
        vec_f=stack(per_layer_vec_f),               # (L, 2, F)      f32
        wfc=wfc.astype(wdt),                        # (D, 128)       bf16 (lane-dense)
        bfc=bfc,                                    # (1, 128)       f32
    )
    return dict(fe=params["fe"], pe=params["pe"], kp=kp)


# ----------------------------------------------------------------------------
if __name__ == "__main__":
    # Small shapes consistent with the module
    cat_cols = ["c0", "c1"]
    cat_unique = {"c0": 10, "c1": 6}
    num_dim = 8
    d_model = 32
    nhead = 4
    num_layers = 2
    dim_feedforward = 64
    max_seq_len = 16
    B, T = 2, 8

    key = jax.random.PRNGKey(0)
    kparam, kc, kn = jax.random.split(key, 3)

    params = init_params(kparam, cat_unique=cat_unique, cat_cols=cat_cols,
                         num_dim=num_dim, d_model=d_model, nhead=nhead,
                         num_layers=num_layers, dim_feedforward=dim_feedforward,
                         max_seq_len=max_seq_len)
    prep = prepare_params(params, d_model=d_model, nhead=nhead,
                          dim_feedforward=dim_feedforward)

    # input: (B, T, cat_len + num_dim); categorical ids stored as floats like PyTorch
    cat_part = jax.random.randint(kc, (B, T, len(cat_cols)), 0, 6).astype(jnp.float32)
    num_part = jax.random.normal(kn, (B, T, num_dim), dtype=jnp.float32)
    src = jnp.concatenate([cat_part, num_part], axis=-1)            # (2, 8, 10)

    fwd = jax.jit(functools.partial(horse_transformer_forward,
                                    cat_cols=cat_cols, d_model=d_model,
                                    nhead=nhead, num_layers=num_layers))
    out = fwd(src, prep)
    jax.block_until_ready(out)
    assert out.shape == (B, T, 1), out.shape
    assert bool(jnp.all(jnp.isfinite(out)))
    print("KERNEL_OK")
</pallas_src>

<mosaic_0001>
module attributes {stable_mosaic.version = 11 : i64} {
  func.func @_fused_model_kernel(%arg0: i32, %arg1: i32, %arg2: memref<1x8x32xf32, #tpu.memory_space<vmem>>, %arg3: memref<1x12x32x8xbf16, #tpu.memory_space<vmem>>, %arg4: memref<1x12x1x8xf32, #tpu.memory_space<vmem>>, %arg5: memref<1x4x8x32xbf16, #tpu.memory_space<vmem>>, %arg6: memref<1x6x32xf32, #tpu.memory_space<vmem>>, %arg7: memref<1x32x64xbf16, #tpu.memory_space<vmem>>, %arg8: memref<1x64x64xbf16, #tpu.memory_space<vmem>>, %arg9: memref<1x64x32xbf16, #tpu.memory_space<vmem>>, %arg10: memref<1x2x64xf32, #tpu.memory_space<vmem>>, %arg11: memref<32x128xbf16, #tpu.memory_space<vmem>>, %arg12: memref<1x128xf32, #tpu.memory_space<vmem>>, %arg13: memref<1x8x128xf32, #tpu.memory_space<vmem>>, %arg14: memref<8x32xf32, #tpu.memory_space<vmem>>) attributes {dimension_semantics = [#tpu.dimension_semantics<parallel>, #tpu.dimension_semantics<arbitrary>], iteration_bounds = array<i64: 2, 2>, scalar_prefetch = 0 : i64, scratch_operands = 1 : i64, tpu.core_type = #tpu.core_type<tc>, window_params = [{transform_indices = @transform_0, window_bounds = array<i64: 1, 8, 32>}, {transform_indices = @transform_1, window_bounds = array<i64: 1, 12, 32, 8>}, {transform_indices = @transform_2, window_bounds = array<i64: 1, 12, 1, 8>}, {transform_indices = @transform_3, window_bounds = array<i64: 1, 4, 8, 32>}, {transform_indices = @transform_4, window_bounds = array<i64: 1, 6, 32>}, {transform_indices = @transform_5, window_bounds = array<i64: 1, 32, 64>}, {transform_indices = @transform_6, window_bounds = array<i64: 1, 64, 64>}, {transform_indices = @transform_7, window_bounds = array<i64: 1, 64, 32>}, {transform_indices = @transform_8, window_bounds = array<i64: 1, 2, 64>}, {pipeline_mode = #tpu.pipeline_mode<synchronous>, transform_indices = @transform_9, window_bounds = array<i64: 32, 128>}, {pipeline_mode = #tpu.pipeline_mode<synchronous>, transform_indices = @transform_10, window_bounds = array<i64: 1, 128>}, {transform_indices = @transform_11, window_bounds = array<i64: 1, 8, 128>}]} {
    %c0_i32 = arith.constant 0 : i32
    %0 = arith.cmpi eq, %arg1, %c0_i32 : i32
    %1 = arith.extui %0 : i1 to i32
    %c0_i32_0 = arith.constant 0 : i32
    %2 = arith.cmpi ne, %1, %c0_i32_0 : i32
    scf.if %2 {
      %c0_58 = arith.constant 0 : index
      %c0_59 = arith.constant 0 : index
      %c0_60 = arith.constant 0 : index
      %133 = vector.load %arg2[%c0_58, %c0_59, %c0_60] : memref<1x8x32xf32, #tpu.memory_space<vmem>>, vector<1x8x32xf32>
      %134 = vector.shape_cast %133 : vector<1x8x32xf32> to vector<8x32xf32>
      %c0_61 = arith.constant 0 : index
      %c0_62 = arith.constant 0 : index
      %135 = vector.load %arg14[%c0_61, %c0_62] : memref<8x32xf32, #tpu.memory_space<vmem>>, vector<8x32xf32>
      tpu.vector_store %arg14[%c0_61, %c0_62], %134 {strides = array<i32>} : memref<8x32xf32, #tpu.memory_space<vmem>>, vector<8x32xf32>,
    } else {
    }
    %c0 = arith.constant 0 : index
    %c0_1 = arith.constant 0 : index
    %3 = vector.load %arg14[%c0, %c0_1] : memref<8x32xf32, #tpu.memory_space<vmem>>, vector<8x32xf32>
    %4 = arith.truncf %3 : vector<8x32xf32> to vector<8x32xbf16>
    %c0_2 = arith.constant 0 : index
    %c0_3 = arith.constant 0 : index
    %c0_4 = arith.constant 0 : index
    %c0_5 = arith.constant 0 : index
    %5 = vector.load %arg3[%c0_2, %c0_3, %c0_4, %c0_5] : memref<1x12x32x8xbf16, #tpu.memory_space<vmem>>, vector<1x12x32x8xbf16>
    %6 = vector.shape_cast %5 : vector<1x12x32x8xbf16> to vector<12x32x8xbf16>
    %c0_6 = arith.constant 0 : index
    %c0_7 = arith.constant 0 : index
    %c0_8 = arith.constant 0 : index
    %c0_9 = arith.constant 0 : index
    %7 = vector.load %arg4[%c0_6, %c0_7, %c0_8, %c0_9] : memref<1x12x1x8xf32, #tpu.memory_space<vmem>>, vector<1x12x1x8xf32>
    %8 = vector.shape_cast %7 : vector<1x12x1x8xf32> to vector<12x1x8xf32>
    %c0_10 = arith.constant 0 : index
    %c0_11 = arith.constant 0 : index
    %c0_12 = arith.constant 0 : index
    %c0_13 = arith.constant 0 : index
    %9 = vector.load %arg5[%c0_10, %c0_11, %c0_12, %c0_13] : memref<1x4x8x32xbf16, #tpu.memory_space<vmem>>, vector<1x4x8x32xbf16>
    %10 = vector.shape_cast %9 : vector<1x4x8x32xbf16> to vector<4x8x32xbf16>
    %c0_14 = arith.constant 0 : index
    %c0_15 = arith.constant 0 : index
    %c0_16 = arith.constant 0 : index
    %11 = vector.load %arg6[%c0_14, %c0_15, %c0_16] : memref<1x6x32xf32, #tpu.memory_space<vmem>>, vector<1x6x32xf32>
    %12 = vector.shape_cast %11 : vector<1x6x32xf32> to vector<6x32xf32>
    %c0_17 = arith.constant 0 : index
    %c0_18 = arith.constant 0 : index
    %c0_19 = arith.constant 0 : index
    %13 = vector.load %arg10[%c0_17, %c0_18, %c0_19] : memref<1x2x64xf32, #tpu.memory_space<vmem>>, vector<1x2x64xf32>
    %14 = vector.shape_cast %13 : vector<1x2x64xf32> to vector<2x64xf32>
    %15 = vector.extract_strided_slice %12 {offsets = [0, 0], sizes = [1, 32], strides = [1, 1]} : vector<6x32xf32> to vector<1x32xf32>
    %16 = vector.extract_strided_slice %12 {offsets = [1, 0], sizes = [1, 32], strides = [1, 1]} : vector<6x32xf32> to vector<1x32xf32>
    %17 = vector.extract_strided_slice %12 {offsets = [2, 0], sizes = [1, 32], strides = [1, 1]} : vector<6x32xf32> to vector<1x32xf32>
    %18 = vector.extract_strided_slice %12 {offsets = [3, 0], sizes = [1, 32], strides = [1, 1]} : vector<6x32xf32> to vector<1x32xf32>
    %19 = vector.extract_strided_slice %12 {offsets = [4, 0], sizes = [1, 32], strides = [1, 1]} : vector<6x32xf32> to vector<1x32xf32>
    %20 = vector.extract_strided_slice %12 {offsets = [5, 0], sizes = [1, 32], strides = [1, 1]} : vector<6x32xf32> to vector<1x32xf32>
    %21 = vector.extract_strided_slice %14 {offsets = [0, 0], sizes = [1, 64], strides = [1, 1]} : vector<2x64xf32> to vector<1x64xf32>
    %22 = vector.extract_strided_slice %14 {offsets = [1, 0], sizes = [1, 64], strides = [1, 1]} : vector<2x64xf32> to vector<1x64xf32>
    %23 = vector.shape_cast %4 : vector<8x32xbf16> to vector<1x8x32xbf16>
    %24 = vector.shape_cast %23 : vector<1x8x32xbf16> to vector<1x8x32xbf16>
    %25 = vector.broadcast %24 : vector<1x8x32xbf16> to vector<12x8x32xbf16>
    %cst = arith.constant dense<0.000000e+00> : vector<12x8x8xf32>
    %26 = tpu.matmul %25, %6, %cst {dimension_numbers = #tpu.dot_dimension_numbers<[2], [1], [1], [2], [0, 0, 0, 1, 1, 2], [0], [0]>} : vector<12x8x32xbf16>, vector<12x32x8xbf16>, vector<12x8x8xf32> -> vector<12x8x8xf32>
    %27 = vector.broadcast %8 : vector<12x1x8xf32> to vector<12x8x8xf32>
    %28 = arith.addf %26, %27 : vector<12x8x8xf32>
    %29 = arith.truncf %28 : vector<12x8x8xf32> to vector<12x8x8xbf16>
    %30 = vector.extract_strided_slice %29 {offsets = [0, 0, 0], sizes = [4, 8, 8], strides = [1, 1, 1]} : vector<12x8x8xbf16> to vector<4x8x8xbf16>
    %31 = vector.extract_strided_slice %29 {offsets = [4, 0, 0], sizes = [4, 8, 8], strides = [1, 1, 1]} : vector<12x8x8xbf16> to vector<4x8x8xbf16>
    %32 = vector.extract_strided_slice %29 {offsets = [8, 0, 0], sizes = [4, 8, 8], strides = [1, 1, 1]} : vector<12x8x8xbf16> to vector<4x8x8xbf16>
    %cst_20 = arith.constant dense<0.000000e+00> : vector<4x8x8xf32>
    %33 = tpu.matmul %30, %31, %cst_20 {dimension_numbers = #tpu.dot_dimension_numbers<[2], [2], [1], [1], [0, 0, 0, 1, 1, 1], [0], [0]>} : vector<4x8x8xbf16>, vector<4x8x8xbf16>, vector<4x8x8xf32> -> vector<4x8x8xf32>
    %cst_21 = arith.constant 0.353553385 : f32
    %34 = vector.broadcast %cst_21 : f32 to vector<4x8x8xf32>
    %35 = arith.mulf %33, %34 : vector<4x8x8xf32>
    %cst_22 = arith.constant dense<0xFF800000> : vector<4x8xf32>
    %36 = vector.multi_reduction <maximumf>, %35, %cst_22 [2] : vector<4x8x8xf32> to vector<4x8xf32>
    %37 = vector.shape_cast %36 : vector<4x8xf32> to vector<4x8x1xf32>
    %38 = vector.broadcast %37 : vector<4x8x1xf32> to vector<4x8x8xf32>
    %39 = arith.subf %35, %38 : vector<4x8x8xf32>
    %40 = math.exp %39 : vector<4x8x8xf32>
    %cst_23 = arith.constant dense<0.000000e+00> : vector<4x8xf32>
    %41 = vector.multi_reduction <add>, %40, %cst_23 [2] : vector<4x8x8xf32> to vector<4x8xf32>
    %42 = vector.shape_cast %41 : vector<4x8xf32> to vector<4x8x1xf32>
    %43 = tpu.reciprocal %42 {approx = true} : vector<4x8x1xf32> -> vector<4x8x1xf32>
    %44 = vector.broadcast %43 : vector<4x8x1xf32> to vector<4x8x8xf32>
    %45 = arith.mulf %40, %44 : vector<4x8x8xf32>
    %46 = arith.truncf %45 : vector<4x8x8xf32> to vector<4x8x8xbf16>
    %cst_24 = arith.constant dense<0.000000e+00> : vector<4x8x8xf32>
    %47 = tpu.matmul %46, %32, %cst_24 {dimension_numbers = #tpu.dot_dimension_numbers<[2], [1], [1], [2], [0, 0, 0, 1, 1, 2], [0], [0]>} : vector<4x8x8xbf16>, vector<4x8x8xbf16>, vector<4x8x8xf32> -> vector<4x8x8xf32>
    %48 = arith.truncf %47 : vector<4x8x8xf32> to vector<4x8x8xbf16>
    %cst_25 = arith.constant dense<0.000000e+00> : vector<4x8x32xf32>
    %49 = tpu.matmul %48, %10, %cst_25 {dimension_numbers = #tpu.dot_dimension_numbers<[2], [1], [1], [2], [0, 0, 0, 1, 1, 2], [0], [0]>} : vector<4x8x8xbf16>, vector<4x8x32xbf16>, vector<4x8x32xf32> -> vector<4x8x32xf32>
    %cst_26 = arith.constant dense<0.000000e+00> : vector<8x32xf32>
    %50 = vector.multi_reduction <add>, %49, %cst_26 [0] : vector<4x8x32xf32> to vector<8x32xf32>
    %51 = vector.broadcast %15 : vector<1x32xf32> to vector<8x32xf32>
    %52 = arith.addf %50, %51 : vector<8x32xf32>
    %53 = arith.addf %3, %52 : vector<8x32xf32>
    %cst_27 = arith.constant dense<0.000000e+00> : vector<8xf32>
    %54 = vector.multi_reduction <add>, %53, %cst_27 [1] : vector<8x32xf32> to vector<8xf32>
    %55 = vector.shape_cast %54 : vector<8xf32> to vector<8x1xf32>
    %cst_28 = arith.constant 3.200000e+01 : f32
    %56 = vector.broadcast %cst_28 : f32 to vector<8x1xf32>
    %57 = arith.divf %55, %56 : vector<8x1xf32>
    %58 = vector.broadcast %57 : vector<8x1xf32> to vector<8x32xf32>
    %59 = arith.subf %53, %58 : vector<8x32xf32>
    %60 = arith.mulf %59, %59 : vector<8x32xf32>
    %cst_29 = arith.constant dense<0.000000e+00> : vector<8xf32>
    %61 = vector.multi_reduction <add>, %60, %cst_29 [1] : vector<8x32xf32> to vector<8xf32>
    %62 = vector.shape_cast %61 : vector<8xf32> to vector<8x1xf32>
    %cst_30 = arith.constant 3.200000e+01 : f32
    %63 = vector.broadcast %cst_30 : f32 to vector<8x1xf32>
    %64 = arith.divf %62, %63 : vector<8x1xf32>
    %cst_31 = arith.constant 9.99999974E-6 : f32
    %65 = vector.broadcast %cst_31 : f32 to vector<8x1xf32>
    %66 = arith.addf %64, %65 : vector<8x1xf32>
    %67 = math.rsqrt %66 : vector<8x1xf32>
    %68 = vector.broadcast %67 : vector<8x1xf32> to vector<8x32xf32>
    %69 = arith.mulf %59, %68 : vector<8x32xf32>
    %70 = vector.broadcast %16 : vector<1x32xf32> to vector<8x32xf32>
    %71 = arith.mulf %69, %70 : vector<8x32xf32>
    %72 = vector.broadcast %17 : vector<1x32xf32> to vector<8x32xf32>
    %73 = arith.addf %71, %72 : vector<8x32xf32>
    %74 = arith.truncf %73 : vector<8x32xf32> to vector<8x32xbf16>
    %c0_32 = arith.constant 0 : index
    %c0_33 = arith.constant 0 : index
    %c0_34 = arith.constant 0 : index
    %75 = vector.load %arg7[%c0_32, %c0_33, %c0_34] : memref<1x32x64xbf16, #tpu.memory_space<vmem>>, vector<1x32x64xbf16>
    %76 = vector.shape_cast %75 : vector<1x32x64xbf16> to vector<32x64xbf16>
    %cst_35 = arith.constant dense<0.000000e+00> : vector<8x64xf32>
    %77 = tpu.matmul %74, %76, %cst_35 {dimension_numbers = #tpu.dot_dimension_numbers<[1], [0], [0], [1], [0, 0, 1, 1], [], []>} : vector<8x32xbf16>, vector<32x64xbf16>, vector<8x64xf32> -> vector<8x64xf32>
    %78 = vector.broadcast %21 : vector<1x64xf32> to vector<8x64xf32>
    %79 = arith.addf %77, %78 : vector<8x64xf32>
    %cst_36 = arith.constant 5.000000e-01 : f32
    %80 = vector.broadcast %cst_36 : f32 to vector<8x64xf32>
    %81 = arith.mulf %80, %79 : vector<8x64xf32>
    %cst_37 = arith.constant 0.707106769 : f32
    %82 = vector.broadcast %cst_37 : f32 to vector<8x64xf32>
    %83 = arith.mulf %79, %82 : vector<8x64xf32>
    %84 = math.erf %83 : vector<8x64xf32>
    %cst_38 = arith.constant 1.000000e+00 : f32
    %85 = vector.broadcast %cst_38 : f32 to vector<8x64xf32>
    %86 = arith.addf %85, %84 : vector<8x64xf32>
    %87 = arith.mulf %81, %86 : vector<8x64xf32>
    %88 = arith.truncf %87 : vector<8x64xf32> to vector<8x64xbf16>
    %c0_39 = arith.constant 0 : index
    %c0_40 = arith.constant 0 : index
    %c0_41 = arith.constant 0 : index
    %89 = vector.load %arg8[%c0_39, %c0_40, %c0_41] : memref<1x64x64xbf16, #tpu.memory_space<vmem>>, vector<1x64x64xbf16>
    %90 = vector.shape_cast %89 : vector<1x64x64xbf16> to vector<64x64xbf16>
    %cst_42 = arith.constant dense<0.000000e+00> : vector<8x64xf32>
    %91 = tpu.matmul %88, %90, %cst_42 {dimension_numbers = #tpu.dot_dimension_numbers<[1], [0], [0], [1], [0, 0, 1, 1], [], []>} : vector<8x64xbf16>, vector<64x64xbf16>, vector<8x64xf32> -> vector<8x64xf32>
    %92 = vector.broadcast %22 : vector<1x64xf32> to vector<8x64xf32>
    %93 = arith.addf %91, %92 : vector<8x64xf32>
    %cst_43 = arith.constant 5.000000e-01 : f32
    %94 = vector.broadcast %cst_43 : f32 to vector<8x64xf32>
    %95 = arith.mulf %94, %93 : vector<8x64xf32>
    %cst_44 = arith.constant 0.707106769 : f32
    %96 = vector.broadcast %cst_44 : f32 to vector<8x64xf32>
    %97 = arith.mulf %93, %96 : vector<8x64xf32>
    %98 = math.erf %97 : vector<8x64xf32>
    %cst_45 = arith.constant 1.000000e+00 : f32
    %99 = vector.broadcast %cst_45 : f32 to vector<8x64xf32>
    %100 = arith.addf %99, %98 : vector<8x64xf32>
    %101 = arith.mulf %95, %100 : vector<8x64xf32>
    %102 = arith.truncf %101 : vector<8x64xf32> to vector<8x64xbf16>
    %c0_46 = arith.constant 0 : index
    %c0_47 = arith.constant 0 : index
    %c0_48 = arith.constant 0 : index
    %103 = vector.load %arg9[%c0_46, %c0_47, %c0_48] : memref<1x64x32xbf16, #tpu.memory_space<vmem>>, vector<1x64x32xbf16>
    %104 = vector.shape_cast %103 : vector<1x64x32xbf16> to vector<64x32xbf16>
    %cst_49 = arith.constant dense<0.000000e+00> : vector<8x32xf32>
    %105 = tpu.matmul %102, %104, %cst_49 {dimension_numbers = #tpu.dot_dimension_numbers<[1], [0], [0], [1], [0, 0, 1, 1], [], []>} : vector<8x64xbf16>, vector<64x32xbf16>, vector<8x32xf32> -> vector<8x32xf32>
    %106 = vector.broadcast %18 : vector<1x32xf32> to vector<8x32xf32>
    %107 = arith.addf %105, %106 : vector<8x32xf32>
    %108 = arith.addf %73, %107 : vector<8x32xf32>
    %cst_50 = arith.constant dense<0.000000e+00> : vector<8xf32>
    %109 = vector.multi_reduction <add>, %108, %cst_50 [1] : vector<8x32xf32> to vector<8xf32>
    %110 = vector.shape_cast %109 : vector<8xf32> to vector<8x1xf32>
    %cst_51 = arith.constant 3.200000e+01 : f32
    %111 = vector.broadcast %cst_51 : f32 to vector<8x1xf32>
    %112 = arith.divf %110, %111 : vector<8x1xf32>
    %113 = vector.broadcast %112 : vector<8x1xf32> to vector<8x32xf32>
    %114 = arith.subf %108, %113 : vector<8x32xf32>
    %115 = arith.mulf %114, %114 : vector<8x32xf32>
    %cst_52 = arith.constant dense<0.000000e+00> : vector<8xf32>
    %116 = vector.multi_reduction <add>, %115, %cst_52 [1] : vector<8x32xf32> to vector<8xf32>
    %117 = vector.shape_cast %116 : vector<8xf32> to vector<8x1xf32>
    %cst_53 = arith.constant 3.200000e+01 : f32
    %118 = vector.broadcast %cst_53 : f32 to vector<8x1xf32>
    %119 = arith.divf %117, %118 : vector<8x1xf32>
    %cst_54 = arith.constant 9.99999974E-6 : f32
    %120 = vector.broadcast %cst_54 : f32 to vector<8x1xf32>
    %121 = arith.addf %119, %120 : vector<8x1xf32>
    %122 = math.rsqrt %121 : vector<8x1xf32>
    %123 = vector.broadcast %122 : vector<8x1xf32> to vector<8x32xf32>
    %124 = arith.mulf %114, %123 : vector<8x32xf32>
    %125 = vector.broadcast %19 : vector<1x32xf32> to vector<8x32xf32>
    %126 = arith.mulf %124, %125 : vector<8x32xf32>
    %127 = vector.broadcast %20 : vector<1x32xf32> to vector<8x32xf32>
    %128 = arith.addf %126, %127 : vector<8x32xf32>
    %c0_55 = arith.constant 0 : index
    %c0_56 = arith.constant 0 : index
    %129 = vector.load %arg14[%c0_55, %c0_56] : memref<8x32xf32, #tpu.memory_space<vmem>>, vector<8x32xf32>
    tpu.vector_store %arg14[%c0_55, %c0_56], %128 {strides = array<i32>} : memref<8x32xf32, #tpu.memory_space<vmem>>, vector<8x32xf32>,
    %c1_i32 = arith.constant 1 : i32
    %130 = arith.cmpi eq, %arg1, %c1_i32 : i32
    %131 = arith.extui %130 : i1 to i32
    %c0_i32_57 = arith.constant 0 : i32
    %132 = arith.cmpi ne, %131, %c0_i32_57 : i32
    scf.if %132 {
      %133 = arith.truncf %128 : vector<8x32xf32> to vector<8x32xbf16>
      %c0_58 = arith.constant 0 : index
      %c0_59 = arith.constant 0 : index
      %134 = vector.load %arg11[%c0_58, %c0_59] : memref<32x128xbf16, #tpu.memory_space<vmem>>, vector<32x128xbf16>
      %cst_60 = arith.constant dense<0.000000e+00> : vector<8x128xf32>
      %135 = tpu.matmul %133, %134, %cst_60 {dimension_numbers = #tpu.dot_dimension_numbers<[1], [0], [0], [1], [0, 0, 1, 1], [], []>} : vector<8x32xbf16>, vector<32x128xbf16>, vector<8x128xf32> -> vector<8x128xf32>
      %c0_61 = arith.constant 0 : index
      %c0_62 = arith.constant 0 : index
      %136 = vector.load %arg12[%c0_61, %c0_62] : memref<1x128xf32, #tpu.memory_space<vmem>>, vector<1x128xf32>
      %137 = vector.broadcast %136 : vector<1x128xf32> to vector<8x128xf32>
      %138 = arith.addf %135, %137 : vector<8x128xf32>
      %c0_63 = arith.constant 0 : index
      %c0_64 = arith.constant 0 : index
      %c0_65 = arith.constant 0 : index
      %139 = vector.load %arg13[%c0_63, %c0_64, %c0_65] : memref<1x8x128xf32, #tpu.memory_space<vmem>>, vector<1x8x128xf32>
      %140 = vector.shape_cast %139 : vector<1x8x128xf32> to vector<8x128xf32>
      %141 = vector.shape_cast %138 : vector<8x128xf32> to vector<1x8x128xf32>
      tpu.vector_store %arg13[%c0_63, %c0_64, %c0_65], %141 {strides = array<i32>} : memref<1x8x128xf32, #tpu.memory_space<vmem>>, vector<1x8x128xf32>,
    } else {
    }
    return
  }
  func.func @transform_0(%arg0: i32, %arg1: i32) -> (i32, i32, i32) {
    %c0_i32 = arith.constant 0 : i32
    %c0_i32_0 = arith.constant 0 : i32
    %c0_i32_1 = arith.constant 0 : i32
    return %arg0, %c0_i32, %c0_i32_0 : i32, i32, i32
  }
  func.func @transform_1(%arg0: i32, %arg1: i32) -> (i32, i32, i32, i32) {
    %c0_i32 = arith.constant 0 : i32
    %c0_i32_0 = arith.constant 0 : i32
    %c0_i32_1 = arith.constant 0 : i32
    %c0_i32_2 = arith.constant 0 : i32
    return %arg1, %c0_i32, %c0_i32_0, %c0_i32_1 : i32, i32, i32, i32
  }
  func.func @transform_2(%arg0: i32, %arg1: i32) -> (i32, i32, i32, i32) {
    %c0_i32 = arith.constant 0 : i32
    %c0_i32_0 = arith.constant 0 : i32
    %c0_i32_1 = arith.constant 0 : i32
    %c0_i32_2 = arith.constant 0 : i32
    return %arg1, %c0_i32, %c0_i32_0, %c0_i32_1 : i32, i32, i32, i32
  }
  func.func @transform_3(%arg0: i32, %arg1: i32) -> (i32, i32, i32, i32) {
    %c0_i32 = arith.constant 0 : i32
    %c0_i32_0 = arith.constant 0 : i32
    %c0_i32_1 = arith.constant 0 : i32
    %c0_i32_2 = arith.constant 0 : i32
    return %arg1, %c0_i32, %c0_i32_0, %c0_i32_1 : i32, i32, i32, i32
  }
  func.func @transform_4(%arg0: i32, %arg1: i32) -> (i32, i32, i32) {
    %c0_i32 = arith.constant 0 : i32
    %c0_i32_0 = arith.constant 0 : i32
    %c0_i32_1 = arith.constant 0 : i32
    return %arg1, %c0_i32, %c0_i32_0 : i32, i32, i32
  }
  func.func @transform_5(%arg0: i32, %arg1: i32) -> (i32, i32, i32) {
    %c0_i32 = arith.constant 0 : i32
    %c0_i32_0 = arith.constant 0 : i32
    %c0_i32_1 = arith.constant 0 : i32
    return %arg1, %c0_i32, %c0_i32_0 : i32, i32, i32
  }
  func.func @transform_6(%arg0: i32, %arg1: i32) -> (i32, i32, i32) {
    %c0_i32 = arith.constant 0 : i32
    %c0_i32_0 = arith.constant 0 : i32
    %c0_i32_1 = arith.constant 0 : i32
    return %arg1, %c0_i32, %c0_i32_0 : i32, i32, i32
  }
  func.func @transform_7(%arg0: i32, %arg1: i32) -> (i32, i32, i32) {
    %c0_i32 = arith.constant 0 : i32
    %c0_i32_0 = arith.constant 0 : i32
    %c0_i32_1 = arith.constant 0 : i32
    return %arg1, %c0_i32, %c0_i32_0 : i32, i32, i32
  }
  func.func @transform_8(%arg0: i32, %arg1: i32) -> (i32, i32, i32) {
    %c0_i32 = arith.constant 0 : i32
    %c0_i32_0 = arith.constant 0 : i32
    %c0_i32_1 = arith.constant 0 : i32
    return %arg1, %c0_i32, %c0_i32_0 : i32, i32, i32
  }
  func.func @transform_9(%arg0: i32, %arg1: i32) -> (i32, i32) {
    %c0_i32 = arith.constant 0 : i32
    %c0_i32_0 = arith.constant 0 : i32
    %c0_i32_1 = arith.constant 0 : i32
    return %c0_i32, %c0_i32_0 : i32, i32
  }
  func.func @transform_10(%arg0: i32, %arg1: i32) -> (i32, i32) {
    %c0_i32 = arith.constant 0 : i32
    %c0_i32_0 = arith.constant 0 : i32
    %c0_i32_1 = arith.constant 0 : i32
    return %c0_i32, %c0_i32_0 : i32, i32
  }
  func.func @transform_11(%arg0: i32, %arg1: i32) -> (i32, i32, i32) {
    %c0_i32 = arith.constant 0 : i32
    %c0_i32_0 = arith.constant 0 : i32
    %c0_i32_1 = arith.constant 0 : i32
    return %arg0, %c0_i32, %c0_i32_0 : i32, i32, i32
  }
}

</mosaic_0001>

<bundles_post_ra>
// kernel: horse_transformer_forward.1
= control target key start
LH: loop header
LB: loop body
LE: loop exit
PB: predicated region body
PF: predicated region fallthrough
CT: control target
= control target key end

     0   :  { %s2174_s17 = smov 0   ;;  %s2176_s18 = smov 0   ;;  %s2420_s0 = inlined_call_operand.vmem [shape: f32[2,8,32], index: 0, kind: input, shape index: {}]   ;;  %s2421_s1 = inlined_call_operand.vmem [shape: bf16[2,12,32,8], index: 1, kind: input, shape index: {}]   ;;  %s2422_s2 = inlined_call_operand.vmem [shape: f32[2,12,1,8], index: 2, kind: input, shape index: {}]   ;;  %s2423_s3 = inlined_call_operand.vmem [shape: bf16[2,4,8,32], index: 3, kind: input, shape index: {}]   ;;  %s2424_s4 = inlined_call_operand.vmem [shape: f32[2,6,32], index: 4, kind: input, shape index: {}]   ;;  %s2425_s5 = inlined_call_operand.vmem [shape: bf16[2,32,64], index: 5, kind: input, shape index: {}]   ;;  %s2426_s6 = inlined_call_operand.vmem [shape: bf16[2,64,64], index: 6, kind: input, shape index: {}]   ;;  %s2427_s7 = inlined_call_operand.vmem [shape: bf16[2,64,32], index: 7, kind: input, shape index: {}]   ;;  %s2428_s8 = inlined_call_operand.vmem [shape: f32[2,2,64], index: 8, kind: input, shape index: {}]   ;;  %s2429_s9 = inlined_call_operand.vmem [shape: bf16[32,128], index: 9, kind: input, shape index: {}]   ;;  %s2430_s10 = inlined_call_operand.vmem [shape: f32[1,128], index: 10, kind: input, shape index: {}]   ;;  %s2431_s11 = inlined_call_operand.vmem [shape: f32[2,8,128], index: 11, kind: output, shape index: {}]  }
   0x1   :  { %2435 = sst [smem:[#allocation8_spill]] %s2420_s0  ;;  %s2178_s19 = smov 0  }
   0x2   :  { %2436 = sst [smem:[#allocation9_spill]] %s2421_s1  ;;  %s2180_s20 = smov 0  }
   0x3   :  { %2437 = sst [smem:[#allocation10_spill]] %s2423_s3  ;;  %s2182_s21 = smov 0  }
   0x4   :  { %2438 = sst [smem:[#allocation11_spill]] %s2430_s10 }
   0x5 LB: > { %2439 = sst [smem:[#allocation3_spill]] %s2103_s19  ;;  %s30_s22 = sadd.s32 1, %s2103_s19  ;;  %s2111_s21 = sphi %s2182_s21, %s21_s21   ;;  %s2107_s20 = sphi %s2180_s20, %s2452_s20   ;;  %s2103_s19 = sphi %s2178_s19, %s2451_s19   ;;  %s2099_s18 = sphi %s2176_s18, %s2450_s18   ;;  %s2095_s17 = sphi %s2174_s17, %s2449_s17  }
   0x6   : > { %2440 = sst [smem:[#allocation4_spill]] %s2107_s20  ;;  %s33_s23 = sadd.s32 1, %s2107_s20 }
   0x7   : > { %2441 = sst [smem:[#allocation5_spill]] %s2111_s21  ;;  %p31_p0 = scmp.ge.s32.totalorder %s30_s22, 2 }
   0x8   : > { %p1759_p1 = scmp.ge.s32.totalorder %s2111_s21, 1  ;;  %p425_p2 = scmp.lt.s32.totalorder %s2111_s21, 5 }
   0x9   : > { %s2454_s22 = smov (%p31_p0, %s30_s22), 0  ;;  %s2456_s23 = smov (!%p31_p0, %s33_s23), %s2107_s20 }
   0xa   : > { %2442 = sst [smem:[#allocation6_spill]] %s2454_s22  ;;  %p426_p3 = pnand %p1759_p1, %p425_p2 }
   0xb   : > { %p35_p4 = scmp.ge.s32.totalorder %s2456_s23, 2  ;;  %p500_p5 = scmp.lt.s32.totalorder (!%p426_p3), %s2099_s18, 1 }
   0xc   : > { %429 = sbr.rel (%p426_p3) target bundleno = 2056 (0x808), region = 64  ;;  %p504_p6 = scmp.lt.s32.totalorder (!%p426_p3), %s2095_s17, 1 }
   0xd   : > { %s2458_s23 = smov (%p35_p4, %s2456_s23), 0  ;;  %s2444_s0 = sld [smem:[#allocation8_spill]] (!%p426_p3) }
   0xe   : > { %2443 = sst [smem:[#allocation7_spill]] %s2458_s23  ;;  %p1773_p7 = scmp.ne.s32.totalorder (!%p426_p3), %s2095_s17, 0 }
   0xf   : > { %s2445_s1 = sld [smem:[#allocation9_spill]] (!%p426_p3) }
  0x10   : > { %s2446_s3 = sld [smem:[#allocation10_spill]] (!%p426_p3) }
  0x11   : > { %s2460_s18 = smov (!%p500_p5, %s2099_s18), 1 }
  0x12   : > { %s505_s24 = scalar_select %p504_p6, %s2095_s17, 1 }
  0x13   : > { %s1760_s25 = sshll.u32 %s2460_s18, 3 }
  0x14   : > { %s503_s28 = scalar_lea.vmem %s2444_s0, %s1760_s25  ;;  %s1991_s29 = smul.u32 192, %s505_s24 }
  0x15   : > { %s1992_s30 = smul.u32 12, %s505_s24  ;;  %s1951_s12 = sshll.u32 %s505_s24, 4 }
  0x16   : > { %s2214_s15 = scalar_lea.vmem %s2445_s1, %s1991_s29  ;;  %s2219_s22 = scalar_lea.vmem %s2446_s3, %s1951_s12 }
  0x17   : > { %s2224_s18 = scalar_lea.vmem %s2422_s2, %s1992_s30  ;;  %s1764_s26 = sshll.u32 %s505_s24, 3 }
  0x18   : > { %s2229_s21 = scalar_lea.vmem %s2424_s4, %s1764_s26  ;;  %s2234_s29 = scalar_lea.vmem %s2425_s5, %s1951_s12 }
  0x19   : > { %s1953_s14 = sshll.u32 %s505_s24, 5  ;;  %s1771_s23 = sshll.u32 %s505_s24, 1 }
  0x1a   : > { %s2239_s3 = scalar_lea.vmem %s2426_s6, %s1953_s14  ;;  %s2244_s30 = scalar_lea.vmem %s2427_s7, %s1953_s14 }
  0x1b   : > { %s2249_s27 = scalar_lea.vmem %s2428_s8, %s1771_s23  ;;  %s2254_s13 = scalar_lea.vmem %s2431_s11, %s1760_s25 }
  0x1c   : > { %549 = sbr.rel (%p1773_p7) target bundleno = 35 (0x23), region = 68 }
  0x21   : > { %v550_v0 = vld [vmem:[%s503_s28] sm:$0xff]  ;;  %vm551_vm0 = vcmask 261120  }
  0x22   : > { %552 = vst.msk [vmem:[#allocation2] sm:$0xff] %vm551_vm0, %v550_v0 }
  0x23 PF: > { %v1956_v1 = vld [vmem:[%s2214_s15 + $0x8] sm:$0xff]  ;;  %v1958_v2 = vld [vmem:[%s2214_s15 + $0x18] sm:$0xff]  ;;  %v1955_v5 = vld [vmem:[%s2214_s15] sm:$0xff]  ;;  %vm669_vm1 = vcmask 261120   ;;  %vm973_vm2 = vcmask 64512   ;;  %vm1105_vm3 = vcmask 1043456  }
  0x24   : > { %v1960_v3 = vld [vmem:[%s2214_s15 + $0x28] sm:$0xff]  ;;  %v1962_v4 = vld [vmem:[%s2214_s15 + $0x38] sm:$0xff]  ;;  %679 = vmatpush.bf16.msra.mxu0 %v1956_v1  ;;  %704 = vmatpush.bf16.msra.mxu1 %v1958_v2  ;;  %v1957_v6 = vld [vmem:[%s2214_s15 + $0x10] sm:$0xff]  ;;  %vm1414_vm12 = vcmask 523264   ;;  %p1939_p8 = scmp.ne.s32.totalorder %s2095_s17, 1 }
  0x25   : > { %729 = vmatpush.bf16.msra.mxu2 %v1960_v3  ;;  %754 = vmatpush.bf16.msra.mxu3 %v1962_v4  ;;  %v1959_v8 = vld [vmem:[%s2214_s15 + $0x20] sm:$0xff]  ;;  %v1961_v9 = vld [vmem:[%s2214_s15 + $0x30] sm:$0xff]  ;;  %v1964_v10 = vld [vmem:[%s2214_s15 + $0x48] sm:$0xff]  ;;  %s2447_s28 = sld [smem:[#allocation11_spill]] (!%p1939_p8) }
  0x26   : > { %v1966_v11 = vld [vmem:[%s2214_s15 + $0x58] sm:$0xff]  ;;  %v1968_v13 = vld [vmem:[%s2214_s15 + $0x68] sm:$0xff]  ;;  %v1963_v15 = vld [vmem:[%s2214_s15 + $0x40] sm:$0xff] }
  0x27   : > { %v1970_v14 = vld [vmem:[%s2214_s15 + $0x78] sm:$0xff]  ;;  %v1965_v16 = vld [vmem:[%s2214_s15 + $0x50] sm:$0xff]  ;;  %v1967_v17 = vld [vmem:[%s2214_s15 + $0x60] sm:$0xff] }
  0x28   : > { %680 = vmatpush.bf16.msra.mxu0 %v1955_v5  ;;  %705 = vmatpush.bf16.msra.mxu1 %v1957_v6  ;;  %v1969_v18 = vld [vmem:[%s2214_s15 + $0x70] sm:$0xff]  ;;  %v1976_v19 = vld [vmem:[%s2214_s15 + $0xa8] sm:$0xff]  ;;  %v1974_v21 = vld [vmem:[%s2214_s15 + $0x98] sm:$0xff] }
  0x29   : > { %v2263_v7 = vld [vmem:[#allocation2] sm:$0xff]  ;;  %730 = vmatpush.bf16.msra.mxu2 %v1959_v8  ;;  %755 = vmatpush.bf16.msra.mxu3 %v1961_v9  ;;  %v1972_v20 = vld [vmem:[%s2214_s15 + $0x88] sm:$0xff]  ;;  %v1973_v24 = vld [vmem:[%s2214_s15 + $0x90] sm:$0xff] }
  0x2a   : > { %v554_v12 = vpack.c.bf16 %v2263_v7, %v2263_v7  ;;  %v1975_v22 = vld [vmem:[%s2214_s15 + $0xa0] sm:$0xff]  ;;  %v1978_v25 = vld [vmem:[%s2214_s15 + $0xb8] sm:$0xff]  ;;  %v1977_v26 = vld [vmem:[%s2214_s15 + $0xb0] sm:$0xff] }
  0x2b   : > { %v1971_v23 = vld [vmem:[%s2214_s15 + $0x80] sm:$0xff]  ;;  %v2042_v8 = vld [vmem:[%s2224_s18 + $0x8] ss:$0 sm:$0xff]  ;;  %v2043_v9 = vld [vmem:[%s2224_s18 + $0x9] ss:$0 sm:$0xff] }
  0x2c   : > { %779 = vmatpush.bf16.msrb.mxu0 %v1964_v10  ;;  %804 = vmatpush.bf16.msrb.mxu1 %v1966_v11  ;;  %v2038_v33 = vld [vmem:[%s2224_s18 + $0x4] ss:$0 sm:$0xff]  ;;  %v2039_v34 = vld [vmem:[%s2224_s18 + $0x5] ss:$0 sm:$0xff]  ;;  %v2035_v41 = vld [vmem:[%s2224_s18 + $0x1] ss:$0 sm:$0xff] }
  0x2d   : > { %1782 = vmatmul.msk.bf16.vlgmr.msra.gmra.mxu0 %vm669_vm1, %v554_v12  ;;  %1791 = vmatmul.msk.bf16.vlgmr.msra.gmra.mxu1 %vm669_vm1, %v554_v12  ;;  %v2034_v44 = vld [vmem:[%s2224_s18] ss:$0 sm:$0xff]  ;;  %v2040_v45 = vld [vmem:[%s2224_s18 + $0x6] ss:$0 sm:$0xff]  ;;  %v2041_v46 = vld [vmem:[%s2224_s18 + $0x7] ss:$0 sm:$0xff] }
  0x2e   : > { %1800 = vmatmul.msk.bf16.vlgmr.msra.gmra.mxu2 %vm669_vm1, %v554_v12  ;;  %1809 = vmatmul.msk.bf16.vlgmr.msra.gmra.mxu3 %vm669_vm1, %v554_v12  ;;  %v2036_v58 = vld [vmem:[%s2224_s18 + $0x2] ss:$0 sm:$0xff]  ;;  %v2037_v59 = vld [vmem:[%s2224_s18 + $0x3] ss:$0 sm:$0xff] }
  0x2f   : > { %829 = vmatpush.bf16.msrb.mxu2 %v1968_v13  ;;  %854 = vmatpush.bf16.msrb.mxu3 %v1970_v14  ;;  %v2044_v14 = vld [vmem:[%s2224_s18 + $0xa] ss:$0 sm:$0xff] }
  0x30   : > { %780 = vmatpush.bf16.msrb.mxu0 %v1963_v15  ;;  %805 = vmatpush.bf16.msrb.mxu1 %v1965_v16 }
  0x33   : > { %830 = vmatpush.bf16.msrb.mxu2 %v1967_v17  ;;  %855 = vmatpush.bf16.msrb.mxu3 %v1969_v18 }
  0x34   : > { %879 = vmatpush.bf16.msra.mxu0 %v1972_v20  ;;  %904 = vmatpush.bf16.msra.mxu1 %v1974_v21 }
  0x37   : > { %929 = vmatpush.bf16.msra.mxu2 %v1976_v19  ;;  %954 = vmatpush.bf16.msra.mxu3 %v1978_v25  ;;  %v2045_v25 = vld [vmem:[%s2224_s18 + $0xb] ss:$0 sm:$0xff] }
  0x38   : > { %880 = vmatpush.bf16.msra.mxu0 %v1971_v23  ;;  %905 = vmatpush.bf16.msra.mxu1 %v1973_v24 }
  0x3b   : > { %930 = vmatpush.bf16.msra.mxu2 %v1975_v22  ;;  %955 = vmatpush.bf16.msra.mxu3 %v1977_v26 }
  0x3d   : > { %1818 = vmatmul.msk.bf16.vlgmr.msrb.gmra.mxu0 %vm669_vm1, %v554_v12  ;;  %1827 = vmatmul.msk.bf16.vlgmr.msrb.gmra.mxu1 %vm669_vm1, %v554_v12 }
  0x3e   : > { %1836 = vmatmul.msk.bf16.vlgmr.msrb.gmra.mxu2 %vm669_vm1, %v554_v12  ;;  %1845 = vmatmul.msk.bf16.vlgmr.msrb.gmra.mxu3 %vm669_vm1, %v554_v12 }
  0x4d   : > { %1854 = vmatmul.msk.bf16.vlgmr.msra.gmra.mxu0 %vm669_vm1, %v554_v12  ;;  %1863 = vmatmul.msk.bf16.vlgmr.msra.gmra.mxu1 %vm669_vm1, %v554_v12 }
  0x4e   : > { %1872 = vmatmul.msk.bf16.vlgmr.msra.gmra.mxu2 %vm669_vm1, %v554_v12  ;;  %1881 = vmatmul.msk.bf16.vlgmr.msra.gmra.mxu3 %vm669_vm1, %v554_v12 }
  0xaa   : > { %v682_v27 = vpop.f32.mrf.mxu0  ;;  %v707_v28 = vpop.f32.mrf.mxu1 }
  0xab   : > { %v708_v49 = vadd.f32 %v2035_v41, %v707_v28  ;;  %v683_v52 = vadd.f32 %v2034_v44, %v682_v27 }
  0xad   : > { %v962_v57 = vpack.c.bf16 %v708_v49, %v708_v49  ;;  %v961_v62 = vpack.c.bf16 %v683_v52, %v683_v52 }
  0xb1   : > { %v732_v29 = vpop.f32.mrf.mxu2  ;;  %v757_v30 = vpop.f32.mrf.mxu3 }
  0xb2   : > { %v684_v31 = vpop.f32.mrf.mxu0  ;;  %v709_v32 = vpop.f32.mrf.mxu1  ;;  %v733_v1 = vadd.f32 %v2036_v58, %v732_v29  ;;  %v758_v2 = vadd.f32 %v2037_v59, %v757_v30 }
  0xb4   : > { %v963_v5 = vpack.c.bf16 %v733_v1, %v733_v1  ;;  %v964_v6 = vpack.c.bf16 %v758_v2, %v758_v2 }
  0xb9   : > { %v734_v35 = vpop.f32.mrf.mxu2  ;;  %v759_v36 = vpop.f32.mrf.mxu3 }
  0xba   : > { %v782_v37 = vpop.f32.mrf.mxu0  ;;  %v807_v38 = vpop.f32.mrf.mxu1 }
  0xbb   : > { %v783_v39 = vadd.f32 %v2038_v33, %v782_v37  ;;  %v808_v40 = vadd.f32 %v2039_v34, %v807_v38 }
  0xbd   : > { %v965_v42 = vpack.c.bf16 %v783_v39, %v783_v39  ;;  %v966_v43 = vpack.c.bf16 %v808_v40, %v808_v40 }
  0xbf   : > { %v978_v47 = vsel %vm973_vm2, %v965_v42, 0  ;;  %v997_v48 = vsel %vm973_vm2, %v966_v43, 0 }
  0xc0   : > { %987 = vmatpush.bf16.xpose.msrb.mxu0 %v978_v47  ;;  %1006 = vmatpush.bf16.xpose.msrb.mxu1 %v997_v48 }
  0xc1   : > { %v832_v50 = vpop.f32.mrf.mxu2  ;;  %v857_v51 = vpop.f32.mrf.mxu3 }
  0xc2   : > { %v833_v53 = vadd.f32 %v2040_v45, %v832_v50  ;;  %v858_v54 = vadd.f32 %v2041_v46, %v857_v51  ;;  %v784_v55 = vpop.f32.mrf.mxu0  ;;  %v809_v56 = vpop.f32.mrf.mxu1 }
  0xc4   : > { %v967_v60 = vpack.c.bf16 %v833_v53, %v833_v53  ;;  %v968_v61 = vpack.c.bf16 %v858_v54, %v858_v54 }
  0xc6   : > { %v1016_v63 = vsel %vm973_vm2, %v967_v60, 0  ;;  %v1035_v0 = vsel %vm973_vm2, %v968_v61, 0 }
  0xc7   : > { %1025 = vmatpush.bf16.xpose.msrb.mxu2 %v1016_v63  ;;  %1044 = vmatpush.bf16.xpose.msrb.mxu3 %v1035_v0 }
  0xc8   : > { %1882 = vmatmul.msk.bf16.vlgmr.msrb.gmra.mxu0 %vm973_vm2, %v961_v62  ;;  %1883 = vmatmul.msk.bf16.vlgmr.msrb.gmra.mxu1 %vm973_vm2, %v962_v57 }
  0xc9   : > { %v834_v3 = vpop.f32.mrf.mxu2  ;;  %v859_v4 = vpop.f32.mrf.mxu3 }
  0xca   : > { %v882_v10 = vpop.f32.mrf.mxu0  ;;  %v907_v11 = vpop.f32.mrf.mxu1 }
  0xcb   : > { %v883_v12 = vadd.f32 %v2042_v8, %v882_v10  ;;  %v908_v13 = vadd.f32 %v2043_v9, %v907_v11 }
  0xcd   : > { %v969_v15 = vpack.c.bf16 %v883_v12, %v883_v12  ;;  %v970_v16 = vpack.c.bf16 %v908_v13, %v908_v13 }
  0xce   : > { %1884 = vmatmul.msk.bf16.vlgmr.msrb.gmra.mxu2 %vm973_vm2, %v963_v5  ;;  %1885 = vmatmul.msk.bf16.vlgmr.msrb.gmra.mxu3 %vm973_vm2, %v964_v6 }
  0xcf   : > { %v1107_v18 = vsel %vm1105_vm3, %v969_v15, 0  ;;  %v1126_v19 = vsel %vm1105_vm3, %v970_v16, 0 }
  0xd0   : > { %1116 = vmatpush.bf16.msra.mxu0 %v1107_v18  ;;  %1135 = vmatpush.bf16.msra.mxu1 %v1126_v19 }
  0xd1   : > { %v932_v17 = vpop.f32.mrf.mxu2  ;;  %v957_v26 = vpop.f32.mrf.mxu3 }
  0xd2   : > { %v933_v20 = vadd.f32 %v2044_v14, %v932_v17  ;;  %v884_v22 = vpop.f32.mrf.mxu0  ;;  %v909_v23 = vpop.f32.mrf.mxu1  ;;  %v958_v28 = vadd.f32 %v2045_v25, %v957_v26  ;;  %v617_v25 = vld [vmem:[%s2219_s22 + $0x8] sm:$0xf] }
  0xd3   : > { %v616_v23 = vld [vmem:[%s2219_s22 + $0x4] sm:$0xf]  ;;  %v1225_v26 = vsel %vm1105_vm3, %v617_v25, 0 }
  0xd4   : > { %v971_v21 = vpack.c.bf16 %v933_v20, %v933_v20  ;;  %v972_v29 = vpack.c.bf16 %v958_v28, %v958_v28 }
  0xd6   : > { %v1145_v24 = vsel %vm1105_vm3, %v971_v21, 0  ;;  %v1164_v30 = vsel %vm1105_vm3, %v972_v29, 0  ;;  %v615_v21 = vld [vmem:[%s2219_s22] sm:$0xf] }
  0xd7   : > { %1154 = vmatpush.bf16.msra.mxu2 %v1145_v24  ;;  %1173 = vmatpush.bf16.msra.mxu3 %v1164_v30  ;;  %v1187_v22 = vsel %vm1105_vm3, %v615_v21, 0  ;;  %v1206_v24 = vsel %vm1105_vm3, %v616_v23, 0 }
  0xd8   : > { %1196 = vmatpush.bf16.msrb.mxu0 %v1187_v22  ;;  %1215 = vmatpush.bf16.msrb.mxu1 %v1206_v24 }
  0xd9   : > { %v934_v27 = vpop.f32.mrf.mxu2  ;;  %v959_v31 = vpop.f32.mrf.mxu3 }
  0xda   : > { %v618_v27 = vld [vmem:[%s2219_s22 + $0xc] sm:$0xf] }
  0xdb   : > { %1234 = vmatpush.bf16.msrb.mxu2 %v1225_v26  ;;  %v1244_v28 = vsel %vm1105_vm3, %v618_v27, 0  ;;  %v2370_v27 = vld [vmem:[%s2249_s27] sm:$0x3] }
  0xdc   : > { %1253 = vmatpush.bf16.msrb.mxu3 %v1244_v28  ;;  %v1307_v28 = vperm.slane %v2370_v27, 0 }
 0x145   : > { %v989_v32 = vpop.f32.mrf.mxu0  ;;  %v1008_v33 = vpop.f32.mrf.mxu1 }
 0x146   : > { %v1050_v34 = vmul.f32 0.35355338, %v989_v32  ;;  %v1051_v36 = vmul.f32 0.35355338, %v1008_v33 }
 0x148   : > { %v1054_v35 = vsel %vm973_vm2, %v1050_v34, -inf  ;;  %v1057_v39 = vsel %vm973_vm2, %v1051_v36, -inf }
 0x149   : > { %1055 = vmax.xlane.f32.xlu1 %v1054_v35 }
 0x14d   : > { %v991_v37 = vpop.f32.mrf.mxu0  ;;  %v1010_v38 = vpop.f32.mrf.mxu1 }
 0x151   : > { %v1027_v40 = vpop.f32.mrf.mxu2  ;;  %v1046_v41 = vpop.f32.mrf.mxu3  ;;  %1058 = vmax.xlane.f32.xlu1 %v1057_v39 }
 0x152   : > { %v1052_v42 = vmul.f32 0.35355338, %v1027_v40  ;;  %v1053_v44 = vmul.f32 0.35355338, %v1046_v41 }
 0x154   : > { %v1060_v43 = vsel %vm973_vm2, %v1052_v42, -inf  ;;  %v1063_v47 = vsel %vm973_vm2, %v1053_v44, -inf }
 0x155   : > { %1061 = vmax.xlane.f32.xlu0 %v1060_v43 }
 0x159   : > { %v1029_v45 = vpop.f32.mrf.mxu2  ;;  %v1048_v46 = vpop.f32.mrf.mxu3 }
 0x15d   : > { %1064 = vmax.xlane.f32.xlu0 %v1063_v47 }
 0x1bc   : > { %v1056_v48 = vpop.xlane.xlu1 %1055 }
 0x1bd   : > { %v1066_v49 = vsub.f32 %v1050_v34, %v1056_v48 }
 0x1bf   : > { %v1070_v50 = vmul.f32 1.442695, %v1066_v49  ;;  %v2349_v49 = vld [vmem:[%s2229_s21] sm:$0x3f] }
 0x1c0   : > { %v1300_v22 = vperm.slane %v2349_v49, 2 }
 0x1c1   : > { %2046 = vpow2.f32 %v1070_v50 }
 0x1c4   : > { %v1059_v51 = vpop.xlane.xlu1 %1058 }
 0x1c5   : > { %v1067_v52 = vsub.f32 %v1051_v36, %v1059_v51 }
 0x1c7   : > { %v2047_v53 = vpop.eup %2046  ;;  %v1072_v54 = vmul.f32 1.442695, %v1067_v52 }
 0x1c8   : > { %v1062_v55 = vpop.xlane.xlu0 %1061  ;;  %v1078_v56 = vsel %vm973_vm2, %v2047_v53, 0.0 }
 0x1c9   : > { %2048 = vpow2.f32 %v1072_v54  ;;  %v1068_v57 = vsub.f32 %v1052_v42, %v1062_v55  ;;  %1079 = vadd.xlane.f32.xlu0 %v1078_v56  ;;  %v1266_v54 = vperm.slane %v2349_v49, 0 }
 0x1cb   : > { %v1074_v58 = vmul.f32 1.442695, %v1068_v57 }
 0x1cd   : > { %2050 = vpow2.f32 %v1074_v58 }
 0x1cf   : > { %v2049_v59 = vpop.eup %2048 }
 0x1d0   : > { %v1065_v60 = vpop.xlane.xlu0 %1064  ;;  %v1081_v61 = vsel %vm973_vm2, %v2049_v59, 0.0 }
 0x1d1   : > { %v1069_v62 = vsub.f32 %v1053_v44, %v1065_v60  ;;  %1082 = vadd.xlane.f32.xlu1 %v1081_v61  ;;  %v2113_v61 = vmov 32.0  }
 0x1d3   : > { %v2051_v63 = vpop.eup %2050  ;;  %v1076_v0 = vmul.f32 1.442695, %v1069_v62 }
 0x1d4   : > { %v1084_v1 = vsel %vm973_vm2, %v2051_v63, 0.0 }
 0x1d5   : > { %2052 = vpow2.f32 %v1076_v0  ;;  %1085 = vadd.xlane.f32.xlu2 %v1084_v1 }
 0x1db   : > { %v2053_v2 = vpop.eup %2052 }
 0x1dc   : > { %v1087_v3 = vsel %vm973_vm2, %v2053_v2, 0.0 }
 0x1dd   : > { %1088 = vadd.xlane.f32.xlu2 %v1087_v3 }
 0x23c   : > { %v1080_v4 = vpop.xlane.xlu0 %1079 }
 0x23d   : > { %2054 = vrcp.f32 %v1080_v4 }
 0x243   : > { %v2055_v5 = vpop.eup %2054 }
 0x244   : > { %v1094_v6 = vmul.f32 %v2055_v5, %v2047_v53  ;;  %v1083_v8 = vpop.xlane.xlu1 %1082 }
 0x245   : > { %2056 = vrcp.f32 %v1083_v8 }
 0x246   : > { %v1098_v9 = vpack.c.bf16 %v1094_v6, %v1094_v6 }
 0x248   : > { %v1086_v10 = vpop.xlane.xlu2 %1085  ;;  %1886 = vmatmul.msk.bf16.vlgmr.msra.gmra.mxu0 %vm973_vm2, %v1098_v9  ;;  %v1980_v9 = vld [vmem:[%s2234_s29 + $0x8] sm:$0xff] }
 0x249   : > { %2058 = vrcp.f32 %v1086_v10  ;;  %1329 = vmatpush.bf16.msra.mxu0 %v1980_v9  ;;  %v1979_v10 = vld [vmem:[%s2234_s29] sm:$0xff] }
 0x24b   : > { %v2057_v11 = vpop.eup %2056 }
 0x24c   : > { %v1095_v12 = vmul.f32 %v2057_v11, %v2049_v59 }
 0x24d   : > { %1330 = vmatpush.bf16.msra.mxu0 %v1979_v10 }
 0x24e   : > { %v1099_v13 = vpack.c.bf16 %v1095_v12, %v1095_v12 }
 0x24f   : > { %v2059_v14 = vpop.eup %2058 }
 0x250   : > { %v1096_v15 = vmul.f32 %v2059_v14, %v2051_v63  ;;  %v1089_v16 = vpop.xlane.xlu2 %1088  ;;  %1887 = vmatmul.msk.bf16.vlgmr.msra.gmra.mxu1 %vm973_vm2, %v1099_v13 }
 0x251   : > { %2060 = vrcp.f32 %v1089_v16 }
 0x252   : > { %v1100_v17 = vpack.c.bf16 %v1096_v15, %v1096_v15  ;;  %2062 = vrcp.f32 %v2113_v61 }
 0x254   : > { %1888 = vmatmul.msk.bf16.vlgmr.msra.gmra.mxu2 %vm973_vm2, %v1100_v17 }
 0x257   : > { %v2061_v18 = vpop.eup %2060 }
 0x258   : > { %v1097_v19 = vmul.f32 %v2061_v18, %v2053_v2  ;;  %v2063_v62 = vpop.eup %2062 }
 0x259   : > { %v1273_v63 = vmul.f32 32.0, %v2063_v62  ;;  %vm1277_vm4 = vweird.f32 %v2063_v62 }
 0x25a   : > { %v1101_v20 = vpack.c.bf16 %v1097_v19, %v1097_v19 }
 0x25b   : > { %v1274_v0 = vsub.f32 1.0, %v1273_v63 }
 0x25c   : > { %1889 = vmatmul.msk.bf16.vlgmr.msra.gmra.mxu3 %vm973_vm2, %v1101_v20  ;;  %v1298_v20 = vperm.slane %v2349_v49, 1 }
 0x25d   : > { %v1275_v1 = vmul.f32 %v2063_v62, %v1274_v0 }
 0x25f   : > { %v1276_v2 = vadd.f32 %v2063_v62, %v1275_v1 }
 0x261   : > { %v2355_v3 = vsel %vm1277_vm4, %v2063_v62, %v1276_v2 }
 0x2c5   : > { %v1118_v29 = vpop.f32.mrf.mxu0 }
 0x2c6   : > { %v1179_v30 = vpack.c.bf16 %v1118_v29, %v1118_v29 }
 0x2c8   : > { %1890 = vmatmul.msk.bf16.vlgmr.msrb.gmra.mxu0 %vm973_vm2, %v1179_v30 }
 0x2cd   : > { %v1120_v31 = vpop.f32.mrf.mxu0  ;;  %v1137_v32 = vpop.f32.mrf.mxu1 }
 0x2ce   : > { %v1180_v33 = vpack.c.bf16 %v1137_v32, %v1137_v32 }
 0x2d0   : > { %1891 = vmatmul.msk.bf16.vlgmr.msrb.gmra.mxu1 %vm973_vm2, %v1180_v33 }
 0x2d5   : > { %v1139_v34 = vpop.f32.mrf.mxu1 }
 0x2d7   : > { %v1156_v35 = vpop.f32.mrf.mxu2 }
 0x2d8   : > { %v1181_v36 = vpack.c.bf16 %v1156_v35, %v1156_v35  ;;  %v1984_v35 = vld [vmem:[%s2239_s3 + $0x18] sm:$0xff] }
 0x2d9   : > { %1422 = vmatpush.bf16.msra.mxu1 %v1984_v35 }
 0x2da   : > { %1892 = vmatmul.msk.bf16.vlgmr.msrb.gmra.mxu2 %vm973_vm2, %v1181_v36 }
 0x2df   : > { %v1158_v37 = vpop.f32.mrf.mxu2  ;;  %v1175_v38 = vpop.f32.mrf.mxu3 }
 0x2e0   : > { %v1182_v39 = vpack.c.bf16 %v1175_v38, %v1175_v38 }
 0x2e2   : > { %1893 = vmatmul.msk.bf16.vlgmr.msrb.gmra.mxu3 %vm973_vm2, %v1182_v39 }
 0x2e7   : > { %v1177_v40 = vpop.f32.mrf.mxu3 }
 0x2e8   : > { %v1983_v40 = vld [vmem:[%s2239_s3 + $0x10] sm:$0xff] }
 0x2e9   : > { %1423 = vmatpush.bf16.msra.mxu1 %v1983_v40 }
 0x345   : > { %v1198_v41 = vpop.f32.mrf.mxu0 }
 0x346   : > { %v1259_v47 = vsel %vm669_vm1, %v1198_v41, 0.0 }
 0x34d   : > { %v1200_v42 = vpop.f32.mrf.mxu0  ;;  %v1217_v43 = vpop.f32.mrf.mxu1 }
 0x34e   : > { %v1260_v46 = vsel %vm669_vm1, %v1217_v43, 0.0 }
 0x34f   : > { %v1261_v50 = vadd.f32 %v1260_v46, %v1259_v47 }
 0x355   : > { %v1219_v44 = vpop.f32.mrf.mxu1 }
 0x35d   : > { %v1236_v45 = vpop.f32.mrf.mxu2 }
 0x35e   : > { %v1262_v48 = vsel %vm669_vm1, %v1236_v45, 0.0  ;;  %v1982_v45 = vld [vmem:[%s2239_s3 + $0x8] sm:$0xff] }
 0x35f   : > { %v1263_v51 = vadd.f32 %v1262_v48, %v1261_v50  ;;  %1424 = vmatpush.bf16.msra.mxu1 %v1982_v45  ;;  %v1981_v50 = vld [vmem:[%s2239_s3] sm:$0xff] }
 0x363   : > { %1425 = vmatpush.bf16.msra.mxu1 %v1981_v50 }
 0x365   : > { %v1238_v52 = vpop.f32.mrf.mxu2  ;;  %v1255_v53 = vpop.f32.mrf.mxu3 }
 0x366   : > { %v1264_v55 = vsel %vm669_vm1, %v1255_v53, 0.0 }
 0x367   : > { %v1265_v56 = vadd.f32 %v1264_v55, %v1263_v51 }
 0x369   : > { %v1267_v57 = vadd.f32 %v1266_v54, %v1265_v56 }
 0x36b   : > { %v1268_v58 = vadd.f32 %v1267_v57, %v2263_v7 }
 0x36d   : > { %v1257_v59 = vpop.f32.mrf.mxu3  ;;  %v1269_v60 = vsel %vm669_vm1, %v1268_v58, 0.0 }
 0x36e   : > { %1270 = vadd.xlane.f32.xlu2 %v1269_v60 }
 0x3e1   : > { %v1271_v4 = vpop.xlane.xlu2 %1270 }
 0x3e2   : > { %v1279_v5 = vmul.f32 %v2355_v3, %v1271_v4 }
 0x3e4   : > { %v1280_v7 = vsub.f32 %v1268_v58, %v1279_v5 }
 0x3e6   : > { %v1281_v6 = vmul.f32 %v1280_v7, %v1280_v7 }
 0x3e8   : > { %v1282_v8 = vsel %vm669_vm1, %v1281_v6, 0.0 }
 0x3e9   : > { %1283 = vadd.xlane.f32.xlu0 %v1282_v8 }
 0x45c   : > { %v1284_v11 = vpop.xlane.xlu0 %1283 }
 0x45d   : > { %v1285_v12 = vmul.f32 %v1284_v11, %v2355_v3 }
 0x45f   : > { %v1286_v13 = vadd.f32 1e-05, %v1285_v12 }
 0x461   : > { %2064 = vrsqrt.f32 %v1286_v13  ;;  %vm1293_vm6 = vweird.f32 %v1286_v13 }
 0x467   : > { %v2065_v14 = vpop.eup %2064 }
 0x468   : > { %v1288_v15 = vmul.f32 %v2065_v14, %v1286_v13  ;;  %vm1294_vm5 = vweird.f32 %v2065_v14 }
 0x469   : > { %vm1295_vm7 = vmor %vm1293_vm6, %vm1294_vm5 }
 0x46a   : > { %v1289_v16 = vmul.f32 %v2065_v14, %v1288_v15 }
 0x46c   : > { %v1290_v17 = vmul.f32 0.5, %v1289_v16 }
 0x46e   : > { %v1291_v18 = vsub.f32 1.5, %v1290_v17 }
 0x470   : > { %v1292_v19 = vmul.f32 %v2065_v14, %v1291_v18 }
 0x472   : > { %v1296_v21 = vsel %vm1295_vm7, %v2065_v14, %v1292_v19  ;;  %v1389_v14 = vperm.slane %v2370_v27, 1 }
 0x473   : > { %v1297_v23 = vmul.f32 %v1296_v21, %v1280_v7  ;;  %v1988_v21 = vld [vmem:[%s2244_s30 + $0x18] sm:$0xff] }
 0x474   : > { %1516 = vmatpush.bf16.msra.mxu2 %v1988_v21 }
 0x475   : > { %v1299_v24 = vmul.f32 %v1298_v20, %v1297_v23 }
 0x477   : > { %v2364_v25 = vadd.f32 %v1300_v22, %v1299_v24 }
 0x479   : > { %v1302_v26 = vpack.c.bf16 %v2364_v25, %v2364_v25 }
 0x47b   : > { %1902 = vmatmul.msk.bf16.vlgmr.msra.gmra.mxu0 %vm669_vm1, %v1302_v26 }
 0x4f8   : > { %v1332_v29 = vpop.f32.mrf.mxu0 }
 0x4f9   : > { %v1333_v30 = vadd.f32 %v1332_v29, %v1307_v28  ;;  %v1987_v28 = vld [vmem:[%s2244_s30 + $0x10] sm:$0xff] }
 0x4fa   : > { %1517 = vmatpush.bf16.msra.mxu2 %v1987_v28 }
 0x4fb   : > { %v1337_v31 = vmul.f32 0.70710677, %v1333_v30  ;;  %v1336_v10 = vmul.f32 0.5, %v1333_v30 }
 0x4fd   : > { %v1338_v32 = vmul.f32 %v1337_v31, %v1337_v31 }
 0x4ff   : > { %v1339_v33 = vmin.f32 %v1338_v32, 16.0  ;;  %v1986_v32 = vld [vmem:[%s2244_s30 + $0x8] sm:$0xff] }
 0x500   : > { %v1334_v34 = vpop.f32.mrf.mxu0  ;;  %1518 = vmatpush.bf16.msra.mxu2 %v1986_v32 }
 0x501   : > { %v1340_v36 = vmul.f32 2.1237322e-06, %v1339_v33  ;;  %v1351_v37 = vmul.f32 3.8918573e-05, %v1339_v33 }
 0x503   : > { %v1341_v38 = vadd.f32 0.00028619796, %v1340_v36  ;;  %v1352_v39 = vadd.f32 0.001143296, %v1351_v37  ;;  %v1985_v36 = vld [vmem:[%s2244_s30] sm:$0xff] }
 0x504   : > { %1519 = vmatpush.bf16.msra.mxu2 %v1985_v36 }
 0x505   : > { %v1342_v41 = vmul.f32 %v1341_v38, %v1339_v33  ;;  %v1353_v42 = vmul.f32 %v1352_v39, %v1339_v33 }
 0x507   : > { %v1354_v43 = vadd.f32 0.014752088, %v1353_v42  ;;  %v1343_v44 = vadd.f32 0.0036580483, %v1342_v41 }
 0x509   : > { %v1355_v46 = vmul.f32 %v1354_v43, %v1339_v33  ;;  %v1344_v48 = vmul.f32 %v1343_v44, %v1339_v33 }
 0x50b   : > { %v1356_v47 = vadd.f32 0.112945676, %v1355_v46  ;;  %v1345_v53 = vadd.f32 0.05243302, %v1344_v48 }
 0x50d   : > { %v1357_v51 = vmul.f32 %v1356_v47, %v1339_v33  ;;  %v1346_v56 = vmul.f32 %v1345_v53, %v1339_v33 }
 0x50f   : > { %v1358_v52 = vadd.f32 0.4994258, %v1357_v51  ;;  %v1347_v57 = vadd.f32 0.18741608, %v1346_v56 }
 0x511   : > { %v1359_v54 = vmul.f32 %v1358_v52, %v1339_v33  ;;  %v1348_v59 = vmul.f32 %v1347_v57, %v1339_v33 }
 0x513   : > { %v1360_v55 = vadd.f32 1.0, %v1359_v54  ;;  %v1349_v63 = vadd.f32 1.1283791, %v1348_v59 }
 0x515   : > { %2066 = vrcp.f32 %v1360_v55  ;;  %v1372_v62 = vand.u32 2147483648, %v1360_v55  ;;  %v1370_v1 = vand.u32 2147483647, %v1360_v55  ;;  %vm1366_vm9 = vweird.f32 %v1360_v55 }
 0x516   : > { %v1350_v5 = vmul.f32 %v1349_v63, %v1337_v31 }
 0x517   : > { %v1373_v4 = vor.u32 1.1754944e-38, %v1372_v62  ;;  %vm1371_vm11 = vcmp.eq.f32.partialorder %v1370_v1, 8.507059e+37 }
 0x51b   : > { %v2067_v58 = vpop.eup %2066 }
 0x51c   : > { %v1362_v60 = vmul.f32 %v2067_v58, %v1360_v55  ;;  %vm1367_vm8 = vweird.f32 %v2067_v58 }
 0x51d   : > { %vm1368_vm10 = vmor %vm1366_vm9, %vm1367_vm8 }
 0x51e   : > { %v1363_v61 = vsub.f32 1.0, %v1362_v60 }
 0x520   : > { %v1364_v0 = vmul.f32 %v2067_v58, %v1363_v61 }
 0x522   : > { %v1365_v2 = vadd.f32 %v2067_v58, %v1364_v0  ;;  %v1484_v0 = vperm.slane %v2349_v49, 3 }
 0x524   : > { %v1369_v7 = vsel %vm1368_vm10, %v2067_v58, %v1365_v2 }
 0x525   : > { %v1374_v6 = vsel %vm1371_vm11, %v1373_v4, %v1369_v7 }
 0x526   : > { %v1375_v8 = vmul.f32 %v1374_v6, %v1350_v5 }
 0x528   : > { %v1903_v9 = vclamps-f32 %v1375_v8, 1.0 }
 0x52a   : > { %v1378_v11 = vadd.f32 1.0, %v1903_v9 }
 0x52c   : > { %v1379_v12 = vmul.f32 %v1378_v11, %v1336_v10 }
 0x52e   : > { %v1380_v13 = vpack.c.bf16 %v1379_v12, %v1379_v12 }
 0x530   : > { %1920 = vmatmul.msk.bf16.vlgmr.msra.gmra.mxu1 %vm1414_vm12, %v1380_v13 }
 0x5ad   : > { %v1427_v15 = vpop.f32.mrf.mxu1 }
 0x5ae   : > { %v1428_v16 = vadd.f32 %v1427_v15, %v1389_v14 }
 0x5b0   : > { %v1432_v17 = vmul.f32 0.70710677, %v1428_v16  ;;  %v1431_v60 = vmul.f32 0.5, %v1428_v16 }
 0x5b2   : > { %v1433_v18 = vmul.f32 %v1432_v17, %v1432_v17 }
 0x5b4   : > { %v1434_v19 = vmin.f32 %v1433_v18, 16.0 }
 0x5b5   : > { %v1429_v20 = vpop.f32.mrf.mxu1 }
 0x5b6   : > { %v1435_v22 = vmul.f32 2.1237322e-06, %v1434_v19  ;;  %v1446_v23 = vmul.f32 3.8918573e-05, %v1434_v19  ;;  %v1548_v20 = vperm.slane %v2349_v49, 4 }
 0x5b8   : > { %v1436_v24 = vadd.f32 0.00028619796, %v1435_v22  ;;  %v1447_v26 = vadd.f32 0.001143296, %v1446_v23  ;;  %v1550_v22 = vperm.slane %v2349_v49, 5 }
 0x5ba   : > { %v1437_v29 = vmul.f32 %v1436_v24, %v1434_v19  ;;  %v1448_v30 = vmul.f32 %v1447_v26, %v1434_v19 }
 0x5bc   : > { %v1449_v31 = vadd.f32 0.014752088, %v1448_v30  ;;  %v1438_v27 = vadd.f32 0.0036580483, %v1437_v29 }
 0x5be   : > { %v1450_v33 = vmul.f32 %v1449_v31, %v1434_v19  ;;  %v1439_v35 = vmul.f32 %v1438_v27, %v1434_v19 }
 0x5c0   : > { %v1451_v34 = vadd.f32 0.112945676, %v1450_v33  ;;  %v1440_v39 = vadd.f32 0.05243302, %v1439_v35 }
 0x5c2   : > { %v1452_v37 = vmul.f32 %v1451_v34, %v1434_v19  ;;  %v1441_v42 = vmul.f32 %v1440_v39, %v1434_v19 }
 0x5c4   : > { %v1453_v38 = vadd.f32 0.4994258, %v1452_v37  ;;  %v1442_v43 = vadd.f32 0.18741608, %v1441_v42 }
 0x5c6   : > { %v1454_v40 = vmul.f32 %v1453_v38, %v1434_v19  ;;  %v1443_v45 = vmul.f32 %v1442_v43, %v1434_v19 }
 0x5c8   : > { %v1455_v41 = vadd.f32 1.0, %v1454_v40  ;;  %v1444_v50 = vadd.f32 1.1283791, %v1443_v45 }
 0x5ca   : > { %2068 = vrcp.f32 %v1455_v41  ;;  %v1467_v48 = vand.u32 2147483648, %v1455_v41  ;;  %v1465_v52 = vand.u32 2147483647, %v1455_v41  ;;  %vm1461_vm14 = vweird.f32 %v1455_v41 }
 0x5cb   : > { %v1445_v55 = vmul.f32 %v1444_v50, %v1432_v17 }
 0x5cc   : > { %v1468_v54 = vor.u32 1.1754944e-38, %v1467_v48  ;;  %vm1466_vm0 = vcmp.eq.f32.partialorder %v1465_v52, 8.507059e+37 }
 0x5d0   : > { %v2069_v44 = vpop.eup %2068 }
 0x5d1   : > { %v1457_v46 = vmul.f32 %v2069_v44, %v1455_v41  ;;  %vm1462_vm13 = vweird.f32 %v2069_v44 }
 0x5d2   : > { %vm1463_vm15 = vmor %vm1461_vm14, %vm1462_vm13 }
 0x5d3   : > { %v1458_v47 = vsub.f32 1.0, %v1457_v46 }
 0x5d5   : > { %v1459_v51 = vmul.f32 %v2069_v44, %v1458_v47 }
 0x5d7   : > { %v1460_v53 = vadd.f32 %v2069_v44, %v1459_v51 }
 0x5d9   : > { %v1464_v56 = vsel %vm1463_vm15, %v2069_v44, %v1460_v53 }
 0x5da   : > { %v1469_v57 = vsel %vm1466_vm0, %v1468_v54, %v1464_v56 }
 0x5db   : > { %v1470_v58 = vmul.f32 %v1469_v57, %v1445_v55 }
 0x5dd   : > { %v1921_v59 = vclamps-f32 %v1470_v58, 1.0 }
 0x5df   : > { %v1473_v61 = vadd.f32 1.0, %v1921_v59 }
 0x5e1   : > { %v1474_v62 = vmul.f32 %v1473_v61, %v1431_v60 }
 0x5e3   : > { %v1475_v63 = vpack.c.bf16 %v1474_v62, %v1474_v62 }
 0x5e5   : > { %1938 = vmatmul.msk.bf16.vlgmr.msra.gmra.mxu2 %vm1414_vm12, %v1475_v63 }
 0x668   : > { %v1521_v1 = vpop.f32.mrf.mxu2 }
 0x669   : > { %v1522_v2 = vadd.f32 %v1521_v1, %v1484_v0 }
 0x66b   : > { %v1525_v4 = vadd.f32 %v1522_v2, %v2364_v25 }
 0x66d   : > { %v1526_v5 = vsel %vm669_vm1, %v1525_v4, 0.0 }
 0x66e   : > { %1527 = vadd.xlane.f32.xlu1 %v1526_v5 }
 0x670   : > { %v1523_v7 = vpop.f32.mrf.mxu2 }
 0x6e1   : > { %v1528_v6 = vpop.xlane.xlu1 %1527 }
 0x6e2   : > { %v1529_v8 = vmul.f32 %v1528_v6, %v2355_v3 }
 0x6e4   : > { %v1530_v9 = vsub.f32 %v1525_v4, %v1529_v8 }
 0x6e6   : > { %v1531_v10 = vmul.f32 %v1530_v9, %v1530_v9 }
 0x6e8   : > { %v1532_v11 = vsel %vm669_vm1, %v1531_v10, 0.0 }
 0x6e9   : > { %1533 = vadd.xlane.f32.xlu2 %v1532_v11 }
 0x75c   : > { %v1534_v12 = vpop.xlane.xlu2 %1533 }
 0x75d   : > { %v1535_v13 = vmul.f32 %v1534_v12, %v2355_v3 }
 0x75f   : > { %v1536_v14 = vadd.f32 1e-05, %v1535_v13 }
 0x761   : > { %2070 = vrsqrt.f32 %v1536_v14  ;;  %vm1543_vm3 = vweird.f32 %v1536_v14 }
 0x767   : > { %v2071_v15 = vpop.eup %2070 }
 0x768   : > { %v1538_v16 = vmul.f32 %v2071_v15, %v1536_v14  ;;  %vm1544_vm2 = vweird.f32 %v2071_v15 }
 0x769   : > { %vm1545_vm4 = vmor %vm1543_vm3, %vm1544_vm2 }
 0x76a   : > { %v1539_v25 = vmul.f32 %v2071_v15, %v1538_v16 }
 0x76c   : > { %v1540_v17 = vmul.f32 0.5, %v1539_v25 }
 0x76e   : > { %v1541_v18 = vsub.f32 1.5, %v1540_v17 }
 0x770   : > { %v1542_v19 = vmul.f32 %v2071_v15, %v1541_v18 }
 0x772   : > { %v1546_v21 = vsel %vm1545_vm4, %v2071_v15, %v1542_v19 }
 0x773   : > { %v1547_v23 = vmul.f32 %v1546_v21, %v1530_v9 }
 0x775   : > { %v1549_v24 = vmul.f32 %v1548_v20, %v1547_v23  ;;  %1556 = sbr.rel (%p1939_p8) target bundleno = 2056 (0x808), region = 72 }
 0x777   : > { %v1551_v26 = vadd.f32 %v1550_v22, %v1549_v24 }
 0x779   : > { %1552 = vst.msk [vmem:[#allocation2] sm:$0xff] %vm669_vm1, %v1551_v26 }
 0x77a   : > { %v1990_v3 = vld [vmem:[%s2429_s9 + $0x8] sm:$0xff]  ;;  %v1989_v28 = vld [vmem:[%s2429_s9] sm:$0xff]  ;;  %v1557_v29 = vpack.c.bf16 %v1551_v26, %v1551_v26 }
 0x77b   : > { %1587 = vmatpush.bf16.msra.mxu0 %v1990_v3  ;;  %v2072_v49 = vld [vmem:[%s2447_s28] ss:$0 sm:$0xff] }
 0x77f   : > { %1588 = vmatpush.bf16.msra.mxu0 %v1989_v28 }
 0x782   : > { %1948 = vmatmul.msk.bf16.vlgmr.msra.gmra.mxu0 %vm669_vm1, %v1557_v29 }
 0x7ff   : > { %v1590_v30 = vpop.f32.mrf.mxu0 }
 0x800   : > { %v1591_v31 = vadd.f32 %v2072_v49, %v1590_v30 }
 0x802   : > { %1594 = vst [vmem:[%s2254_s13] sm:$0xff] %v1591_v31 }
 0x807   : > { %v1592_v27 = vpop.f32.mrf.mxu0 }
 0x808 PF: > { %s2448_s17 = sld [smem:[#allocation5_spill]] }
 0x809   : > { %s2450_s18 = sld [smem:[#allocation4_spill]] }
 0x80a   : > { %s2451_s19 = sld [smem:[#allocation6_spill]] }
 0x80b   : > { %s2452_s20 = sld [smem:[#allocation7_spill]] }
 0x80e   : > { %s21_s21 = sadd.s32 1, %s2448_s17   ;;  %s2449_s17 = sld [smem:[#allocation3_spill]] }
 0x80f   : > { %p18_p9 = scmp.ge.s32.totalorder %s21_s21, 6  }
 0x811   :  { %20 = sbr.rel (!%p18_p9) target bundleno = 5 (0x5), region = 126 }

</bundles_post_ra>
